<compile_context>
chip_gen: v5e
topology: v5e:2x2
jax: 0.10.0
libtpu: 0.0.40
codegen_flags: <defaults>
</compile_context>

<pallas_src>
import jax
import jax.numpy as jnp
from jax.experimental import pallas as pl
from jax.experimental.pallas import tpu as pltpu


def _norm_linear_kernel(v_ref, w_ref, b_ref, o_ref):
    # v_ref: [K, TB, d_v]   vector-component axis leading (elementwise reduce)
    # w_ref: [d_v, d_f]     transposed nn.Linear weight (resident)
    # b_ref: [1, d_f]       bias (resident)
    # o_ref: [TB, d_f]
    v = v_ref[...].astype(jnp.float32)                      # [K, TB, d_v]
    sq = jnp.sum(v * v, axis=0)                             # [TB, d_v] (VPU adds)
    v_norm = jnp.sqrt(sq)                                   # EUP
    y = jnp.dot(v_norm, w_ref[...].astype(jnp.float32),
                preferred_element_type=jnp.float32)         # MXU: [TB, d_f]
    o_ref[...] = (y + b_ref[...].astype(jnp.float32)).astype(o_ref.dtype)


def norm_linear_vector(v: jax.Array, weight: jax.Array, bias: jax.Array,
                       *, batch_tile: int = 256) -> jax.Array:
    """Pallas NormLinearVector.forward.

    v:      [B, d_v, K]   (K = trailing vector dimension reduced by the norm)
    weight: [d_f, d_v]    (PyTorch nn.Linear layout)
    bias:   [d_f]
    returns [B, d_f]
    """
    assert v.ndim == 3, "expected v of shape [batch, d_v, K]"
    B, d_v, K = v.shape
    d_f, d_vw = weight.shape
    assert d_vw == d_v, "weight in_features must match v's d_v axis"
    assert bias.shape == (d_f,)

    # Layout plumbing (outside the kernel): d_v on the lane axis, weight
    # pre-transposed, bias as a 2-D row.
    v_t = jnp.transpose(v, (2, 0, 1))      # [K, B, d_v]
    w_t = jnp.transpose(weight, (1, 0))    # [d_v, d_f]
    b_2d = bias.reshape(1, d_f)

    tb = min(batch_tile, B)
    grid = (pl.cdiv(B, tb),)

    return pl.pallas_call(
        _norm_linear_kernel,
        out_shape=jax.ShapeDtypeStruct((B, d_f), v.dtype),
        grid=grid,
        in_specs=[
            pl.BlockSpec((K, tb, d_v), lambda i: (0, i, 0)),   # v tile per step
            pl.BlockSpec((d_v, d_f), lambda i: (0, 0)),        # weight resident
            pl.BlockSpec((1, d_f), lambda i: (0, 0)),          # bias resident
        ],
        out_specs=pl.BlockSpec((tb, d_f), lambda i: (i, 0)),
        compiler_params=pltpu.CompilerParams(
            dimension_semantics=("parallel",),
        ),
    )(v_t, w_t, b_2d)


if __name__ == "__main__":
    # Small deterministic example: batch=8, d_v=32, d_f=32, 3-D vectors (K=3).
    B, d_v, d_f, K = 8, 32, 32, 3
    key = jax.random.PRNGKey(0)
    kv, kw, kb = jax.random.split(key, 3)
    v = jax.random.normal(kv, (B, d_v, K), dtype=jnp.float32)
    weight = jax.random.normal(kw, (d_f, d_v), dtype=jnp.float32) * 0.1
    bias = jax.random.normal(kb, (d_f,), dtype=jnp.float32)

    out = norm_linear_vector(v, weight, bias)
    out = jax.block_until_ready(out)

    # Pure-JAX reference of the PyTorch forward.
    v_norm_ref = jnp.sqrt(jnp.sum(v * v, axis=-1))      # torch.norm(v, dim=-1)
    ref = v_norm_ref @ weight.T + bias                  # nn.Linear

    assert out.shape == (B, d_f) and out.dtype == v.dtype
    assert jnp.allclose(out, ref, rtol=1e-5, atol=1e-5), float(
        jnp.max(jnp.abs(out - ref)))
    print("KERNEL_OK")
</pallas_src>

<mosaic_0001>
module attributes {stable_mosaic.version = 11 : i64} {
  func.func @_norm_linear_kernel(%arg0: i32, %arg1: memref<3x8x32xf32, #tpu.memory_space<vmem>>, %arg2: memref<32x32xf32, #tpu.memory_space<vmem>>, %arg3: memref<1x32xf32, #tpu.memory_space<vmem>>, %arg4: memref<8x32xf32, #tpu.memory_space<vmem>>) attributes {dimension_semantics = [#tpu.dimension_semantics<parallel>], iteration_bounds = array<i64: 1>, scalar_prefetch = 0 : i64, scratch_operands = 0 : i64, tpu.core_type = #tpu.core_type<tc>, window_params = [{transform_indices = @transform_0, window_bounds = array<i64: 3, 8, 32>}, {pipeline_mode = #tpu.pipeline_mode<synchronous>, transform_indices = @transform_1, window_bounds = array<i64: 32, 32>}, {pipeline_mode = #tpu.pipeline_mode<synchronous>, transform_indices = @transform_2, window_bounds = array<i64: 1, 32>}, {transform_indices = @transform_3, window_bounds = array<i64: 8, 32>}]} {
    %c0 = arith.constant 0 : index
    %c0_0 = arith.constant 0 : index
    %c0_1 = arith.constant 0 : index
    %0 = vector.load %arg1[%c0, %c0_0, %c0_1] : memref<3x8x32xf32, #tpu.memory_space<vmem>>, vector<3x8x32xf32>
    %1 = arith.mulf %0, %0 : vector<3x8x32xf32>
    %cst = arith.constant dense<0.000000e+00> : vector<8x32xf32>
    %2 = vector.multi_reduction <add>, %1, %cst [0] : vector<3x8x32xf32> to vector<8x32xf32>
    %3 = math.sqrt %2 : vector<8x32xf32>
    %c0_2 = arith.constant 0 : index
    %c0_3 = arith.constant 0 : index
    %4 = vector.load %arg2[%c0_2, %c0_3] : memref<32x32xf32, #tpu.memory_space<vmem>>, vector<32x32xf32>
    %cst_4 = arith.constant dense<0.000000e+00> : vector<8x32xf32>
    %5 = tpu.matmul %3, %4, %cst_4 {dimension_numbers = #tpu.dot_dimension_numbers<[1], [0], [0], [1], [0, 0, 1, 1], [], []>} : vector<8x32xf32>, vector<32x32xf32>, vector<8x32xf32> -> vector<8x32xf32>
    %c0_5 = arith.constant 0 : index
    %c0_6 = arith.constant 0 : index
    %6 = vector.load %arg3[%c0_5, %c0_6] : memref<1x32xf32, #tpu.memory_space<vmem>>, vector<1x32xf32>
    %7 = vector.broadcast %6 : vector<1x32xf32> to vector<8x32xf32>
    %8 = arith.addf %5, %7 : vector<8x32xf32>
    %c0_7 = arith.constant 0 : index
    %c0_8 = arith.constant 0 : index
    %9 = vector.load %arg4[%c0_7, %c0_8] : memref<8x32xf32, #tpu.memory_space<vmem>>, vector<8x32xf32>
    tpu.vector_store %arg4[%c0_7, %c0_8], %8 {strides = array<i32>} : memref<8x32xf32, #tpu.memory_space<vmem>>, vector<8x32xf32>,
    return
  }
  func.func @transform_0(%arg0: i32) -> (i32, i32, i32) {
    %c0_i32 = arith.constant 0 : i32
    %c0_i32_0 = arith.constant 0 : i32
    %c0_i32_1 = arith.constant 0 : i32
    return %c0_i32, %arg0, %c0_i32_0 : i32, i32, i32
  }
  func.func @transform_1(%arg0: i32) -> (i32, i32) {
    %c0_i32 = arith.constant 0 : i32
    %c0_i32_0 = arith.constant 0 : i32
    %c0_i32_1 = arith.constant 0 : i32
    return %c0_i32, %c0_i32_0 : i32, i32
  }
  func.func @transform_2(%arg0: i32) -> (i32, i32) {
    %c0_i32 = arith.constant 0 : i32
    %c0_i32_0 = arith.constant 0 : i32
    %c0_i32_1 = arith.constant 0 : i32
    return %c0_i32, %c0_i32_0 : i32, i32
  }
  func.func @transform_3(%arg0: i32) -> (i32, i32) {
    %c0_i32 = arith.constant 0 : i32
    %c0_i32_0 = arith.constant 0 : i32
    return %arg0, %c0_i32 : i32, i32
  }
}

</mosaic_0001>

<bundles_post_ra>
// kernel: tpu_custom_call.1
= control target key start
LH: loop header
LB: loop body
LE: loop exit
PB: predicated region body
PF: predicated region fallthrough
CT: control target
= control target key end

     0   :  { %8 = vsyncpa [#allocation3], 0  ;;  %s250_s0 = inlined_call_operand.hbm [shape: f32[3,8,32], index: 0, kind: input, shape index: {}]   ;;  %s251_s1 = inlined_call_operand.hbm [shape: f32[32,32], index: 1, kind: input, shape index: {}]   ;;  %s252_s2 = inlined_call_operand.vmem [shape: f32[1,32], index: 2, kind: input, shape index: {}]   ;;  %s253_s3 = inlined_call_operand.hbm [shape: f32[8,32], index: 3, kind: output, shape index: {}]  }
   0x1   :  { %9 = vsyncpa [#allocation6], 0 }
   0x2   :  { %10 = vsyncpa [#allocation4], 0  ;;  %s15_s14 = sshll.u32 %s250_s0, 4  ;;  %s208_s15 = smov [#allocation2]   ;;  %s16_s14 = int_to_ptr.hbm [resolvable:$true] %s15_s14 }
   0x3   :  { %s17_s16 = sshll.u32 %s208_s15, 4  ;;  %s28_s19 = sshll.u32 %s251_s1, 4  ;;  %s18_s16 = int_to_ptr.vmem [resolvable:$true] %s17_s16  ;;  %s29_s19 = int_to_ptr.hbm [resolvable:$true] %s28_s19 }
   0x4   :  { %s209_s20 = smov 128   ;;  %s210_s21 = smov 8  }
   0x5   :  { %23 = dma.hbm_to_vmem [thread:$0]  %s16_s14, 384, %s18_s16, [#allocation3], %s209_s20, %s209_s20, %s210_s21  }
   0x6   :  { %s211_s22 = smov [#allocation5]  }
   0x7   :  { %s30_s23 = sshll.u32 %s211_s22, 4  ;;  %s31_s23 = int_to_ptr.vmem [resolvable:$true] %s30_s23 }
   0x8   :  { %36 = dma.hbm_to_vmem [thread:$0]  %s29_s19, 512, %s31_s23, [#allocation6], %s209_s20, %s209_s20, %s210_s21  }
   0x9   :  { %202 = dma.done.wait [#allocation3], 384  }
   0xa   :  { %203 = vsyncadd [#allocation3], 4294966912 }
   0xb   :  { %204 = dma.done.wait [#allocation6], 512  }
   0xc   :  { %205 = vsyncadd [#allocation6], 4294966784  ;;  %v74_v0 = vld [vmem:[#allocation5 + $0x18] sm:$0xff]  ;;  %v73_v1 = vld [vmem:[#allocation5 + $0x10] sm:$0xff]  ;;  %vm53_vm0 = vcmask 261120   ;;  %s212_s24 = smov [#allocation7]  }
   0xd   :  { %94 = vmatpush.msra.mxu0 %v74_v0  ;;  %v47_v2 = vld [vmem:[#allocation2] sm:$0xff]  ;;  %v48_v3 = vld [vmem:[#allocation2 + $0x8] sm:$0xff]  ;;  %v49_v5 = vld [vmem:[#allocation2 + $0x10] sm:$0xff]  ;;  %s108_s25 = sshll.u32 %s212_s24, 4  ;;  %s110_s28 = sshll.u32 %s253_s3, 4  ;;  %s109_s25 = int_to_ptr.vmem [resolvable:$true] %s108_s25  ;;  %s111_s28 = int_to_ptr.hbm [resolvable:$true] %s110_s28 }
   0xe   :  { %v72_v4 = vld [vmem:[#allocation5 + $0x8] sm:$0xff]  ;;  %v50_v6 = vmul.f32 %v47_v2, %v47_v2  ;;  %v51_v7 = vmul.f32 %v48_v3, %v48_v3  ;;  %v52_v8 = vmul.f32 %v49_v5, %v49_v5  ;;  %v71_v9 = vld [vmem:[#allocation5] sm:$0xff] }
   0xf   :  { %95 = vmatpush.msra.mxu0 %v73_v1  ;;  %v127_v25 = vld [vmem:[%s252_s2] ss:$0 sm:$0xff] }
  0x10   :  { %v54_v10 = vsel %vm53_vm0, %v50_v6, 0.0  ;;  %v55_v11 = vsel %vm53_vm0, %v51_v7, 0.0  ;;  %v57_v13 = vsel %vm53_vm0, %v52_v8, 0.0 }
  0x11   :  { %96 = vmatpush.msra.mxu0 %v72_v4  ;;  %v56_v12 = vadd.f32 %v55_v11, %v54_v10 }
  0x13   :  { %97 = vmatpush.msra.mxu0 %v71_v9  ;;  %v58_v14 = vadd.f32 %v57_v13, %v56_v12 }
  0x15   :  { %128 = vrsqrt.f32 %v58_v14  ;;  %vm66_vm1 = vcmp.eq.f32.partialorder %v58_v14, inf  ;;  %v69_v21 = vand.u32 2147483648, %v58_v14  ;;  %vm68_vm2 = vcmp.eq.f32.partialorder %v58_v14, 0.0 }
  0x1b   :  { %v129_v15 = vpop.eup %128 }
  0x1c   :  { %v60_v16 = vmul.f32 %v129_v15, %v58_v14 }
  0x1e   :  { %v61_v17 = vmul.f32 %v129_v15, %v60_v16 }
  0x20   :  { %v62_v18 = vmul.f32 0.5, %v61_v17 }
  0x22   :  { %v63_v19 = vsub.f32 1.5, %v62_v18 }
  0x24   :  { %v64_v20 = vmul.f32 %v129_v15, %v63_v19 }
  0x26   :  { %v65_v22 = vmul.f32 %v64_v20, %v58_v14 }
  0x28   :  { %v67_v23 = vsel %vm66_vm1, %v58_v14, %v65_v22 }
  0x29   :  { %v70_v24 = vsel %vm68_vm2, %v69_v21, %v67_v23 }
  0x2a   :  { %121 = vmatmul.msk.f32.vlgmr.msra.gmra.mxu0 %vm53_vm0, %v70_v24 }
  0xa7   :  { %v99_v26 = vpop.f32.mrf.mxu0 }
  0xa8   :  { %v100_v27 = vadd.f32 %v127_v25, %v99_v26 }
  0xaa   :  { %102 = vst.msk [vmem:[#allocation7] sm:$0xff] %vm53_vm0, %v100_v27 }
  0xab   :  { %113 = dma.vmem_to_hbm [thread:$0]  %s109_s25, 128, %s111_s28, [#allocation4]  }
  0xac   :  { %206 = dma.done.wait [#allocation4], 128  }
  0xad   :  { %207 = vsyncadd [#allocation4], 4294967168 }
  0xae   :  { %118 = vsyncpa [#allocation3], 1 }
  0xaf   :  { %119 = vsyncpa [#allocation6], 1 }
  0xb0   :  { %120 = vsyncpa [#allocation4], 1 }

</bundles_post_ra>
